<compile_context>
chip_gen: v7x
topology: tpu7x:2x2x1
jax: 0.10.0
libtpu: 0.0.40
codegen_flags: <defaults>
</compile_context>

<pallas_src>
import functools

import jax
import jax.numpy as jnp
from jax import lax
from jax.experimental import pallas as pl
from jax.experimental.pallas import tpu as pltpu


# ---------------------------------------------------------------------------
# In-kernel helpers
# ---------------------------------------------------------------------------
def _score_chunk(u, e):
    """u: (TB, H); e: (TS, TB, H)  ->  (TB, TS) f32 score chunk."""
    prod = e.astype(jnp.float32) * u.astype(jnp.float32)[None]
    return jnp.sum(prod, axis=-1).T                      # (TS, TB) -> (TB, TS)


def _store_chunk(scores_sc, chunk, n_s, ts):
    """Write this sequence tile's (TB, TS) scores into the resident scratch."""
    if n_s == 1:                       # static (trace-time) branch
        scores_sc[...] = chunk
    else:
        start = pl.multiple_of(pl.program_id(1) * ts, ts)
        scores_sc[:, pl.ds(start, ts)] = chunk


def _finalize_softmax(scores_sc, o_ref, n_s):
    """At the last sequence tile: softmax over S and one lane-dense store."""
    @pl.when(pl.program_id(1) == n_s - 1)
    def _():
        scores = scores_sc[...]                          # (TB, S) f32
        m = jnp.max(scores, axis=-1, keepdims=True)
        p = jnp.exp(scores - m)
        denom = jnp.sum(p, axis=-1, keepdims=True)
        o_ref[...] = (p * pl.reciprocal(denom)).astype(o_ref.dtype)


# ---------------------------------------------------------------------------
# Kernels
# ---------------------------------------------------------------------------
def _dot_kernel(h_ref, e_ref, o_ref, scores_sc):
    ts = e_ref.shape[0]
    n_s = scores_sc.shape[-1] // ts
    chunk = _score_chunk(h_ref[0], e_ref[...])
    _store_chunk(scores_sc, chunk, n_s, ts)
    _finalize_softmax(scores_sc, o_ref, n_s)


def _general_kernel(h_ref, e_ref, w_ref, o_ref, scores_sc):
    # torch: energy = enc @ W^T + b ; scores = sum_h hidden * energy
    # rewrite: scores = enc . (hidden @ W)   (+ hidden.b, constant over S ->
    # softmax-invariant, dropped entirely)
    ts = e_ref.shape[0]
    n_s = scores_sc.shape[-1] // ts
    u = lax.dot_general(h_ref[0], w_ref[...], (((1,), (0,)), ((), ())),
                        preferred_element_type=jnp.float32)         # (TB, H)
    chunk = _score_chunk(u, e_ref[...])
    _store_chunk(scores_sc, chunk, n_s, ts)
    _finalize_softmax(scores_sc, o_ref, n_s)


def _concat_kernel(h_ref, e_ref, w1_ref, w2_ref, b_ref, v_ref, o_ref,
                   scores_sc):
    # torch: energy = tanh(cat(hidden_expand, enc) @ W^T + b)
    #               = tanh(hidden @ W1^T + enc @ W2^T + b);  scores = v.energy
    ts, tb, hd = e_ref.shape
    n_s = scores_sc.shape[-1] // ts
    e = e_ref[...]
    bias = b_ref[...].astype(jnp.float32)                            # (1, H)
    v = v_ref[...].astype(jnp.float32)                               # (1, H)
    hp = lax.dot_general(h_ref[0], w1_ref[...], (((1,), (1,)), ((), ())),
                         preferred_element_type=jnp.float32)         # (TB, H)

    if tb % 8 == 0:
        # Layout-free flatten: (TS, TB, H) -> (TS*TB, H) -> one big MXU matmul
        # (raises the MXU M dimension to TB*TS for good systolic occupancy).
        e_flat = e.reshape(ts * tb, hd)
        ep = lax.dot_general(e_flat, w2_ref[...], (((1,), (1,)), ((), ())),
                             preferred_element_type=jnp.float32)     # (TS*TB,H)
        energy = jnp.tanh(ep.reshape(ts, tb, hd) + hp[None] + bias)  # (TS,TB,H)
        chunk = jnp.sum(energy * v, axis=-1).T                       # (TB, TS)
    else:
        # Small, non-8-aligned batch tile (B < 8): per-batch-row 2-D matmuls.
        cols = []
        for bb in range(tb):
            sel = lax.broadcasted_iota(jnp.int32, (1, tb, 1), 1) == bb
            e_b = jnp.sum(jnp.where(sel, e, jnp.zeros_like(e)), axis=1)  # (TS,H)
            ep_b = lax.dot_general(e_b, w2_ref[...], (((1,), (1,)), ((), ())),
                                   preferred_element_type=jnp.float32)  # (TS,H)
            energy_b = jnp.tanh(ep_b + hp[bb:bb + 1, :] + bias)          # (TS,H)
            cols.append(lax.dot_general(v, energy_b, (((1,), (1,)), ((), ())),
                                        preferred_element_type=jnp.float32))
        chunk = jnp.concatenate(cols, axis=0)                            # (TB,TS)

    _store_chunk(scores_sc, chunk, n_s, ts)
    _finalize_softmax(scores_sc, o_ref, n_s)


# ---------------------------------------------------------------------------
# Tile / VMEM sizing
# ---------------------------------------------------------------------------
def _vmem_capacity():
    try:
        return int(pltpu.get_tpu_info().vmem_capacity_bytes)
    except Exception:
        return 64 * 2 ** 20        # conservative: v7x per-TensorCore VMEM


def _batch_tile(B):
    if B <= 8:
        return B
    # Prefer 8-aligned tiles and keep >= 2 batch steps so the "parallel" grid
    # axis can feed both TensorCores on v7x.
    for tb in (128, 64, 32, 16, 8):
        if tb * 2 <= B and B % tb == 0:
            return tb
    return 8                       # ragged last block handled by Pallas


def _seq_tile(S, TB, H, itemsize, budget_bytes):
    # per-S-row VMEM cost of a double-buffered e block plus ~3 f32
    # intermediates of the same shape (concat's ep / energy / product).
    per_row = TB * H * (2 * itemsize + 3 * 4)
    cap = int(min(max(1, budget_bytes // max(per_row, 1)), S, 4096))
    divs = [d for d in range(1, cap + 1) if S % d == 0]
    return max(divs, key=lambda d: (d % 128 == 0, d % 8 == 0, d))


# ---------------------------------------------------------------------------
# Wrapper
# ---------------------------------------------------------------------------
@functools.partial(jax.jit, static_argnames=("method",))
def attn_forward(method, hidden, encoder_outputs, params):
    """hidden: (1, B, H); encoder_outputs: (S, B, H)  ->  (B, 1, S)."""
    S, B, H = encoder_outputs.shape
    out_dtype = encoder_outputs.dtype
    itemsize = jnp.dtype(encoder_outputs.dtype).itemsize

    cap = _vmem_capacity()
    budget = int(cap * 0.85)
    TB = _batch_tile(B)
    TS = _seq_tile(S, TB, H, itemsize, budget // 2)
    n_b = pl.cdiv(B, TB)
    n_s = S // TS

    h_spec = pl.BlockSpec((1, TB, H), lambda bi, si: (0, bi, 0))
    e_spec = pl.BlockSpec((TS, TB, H), lambda bi, si: (si, bi, 0))
    o_spec = pl.BlockSpec((TB, S), lambda bi, si: (bi, 0))

    if method == "dot":
        kernel = _dot_kernel
        ins = (hidden, encoder_outputs)
        specs = [h_spec, e_spec]
        weight_bytes = 0
    elif method == "general":
        w = params["w"]                                   # (H, H)
        kernel = _general_kernel
        ins = (hidden, encoder_outputs, w)
        specs = [h_spec, e_spec, pl.BlockSpec((H, H), lambda bi, si: (0, 0))]
        weight_bytes = w.size * jnp.dtype(w.dtype).itemsize
    elif method == "concat":
        w_full = params["w"]                              # (H, 2H)
        bias2d = params["b"].reshape(1, H)
        v2d = params["v"].reshape(1, H)
        w1, w2 = w_full[:, :H], w_full[:, H:]
        kernel = _concat_kernel
        ins = (hidden, encoder_outputs, w1, w2, bias2d, v2d)
        specs = [h_spec, e_spec,
                 pl.BlockSpec((H, H), lambda bi, si: (0, 0)),
                 pl.BlockSpec((H, H), lambda bi, si: (0, 0)),
                 pl.BlockSpec((1, H), lambda bi, si: (0, 0)),
                 pl.BlockSpec((1, H), lambda bi, si: (0, 0))]
        weight_bytes = ((w_full.size + bias2d.size + v2d.size)
                        * jnp.dtype(w_full.dtype).itemsize)
    else:
        raise ValueError(method)

    # Per-step VMEM need (double-buffered inputs, resident weights & scratch,
    # f32 intermediates), generously padded and clamped below physical VMEM.
    need = (2 * TS * TB * H * itemsize          # e block (double-buffered)
            + 2 * TB * H * itemsize             # h block
            + 2 * weight_bytes                  # resident weights
            + 3 * TB * S * 4                    # out block + scores scratch
            + 3 * TS * TB * H * 4)              # f32 intermediates (concat)
    vmem_limit = int(min(max(4 * need, 32 * 2 ** 20), budget))

    out = pl.pallas_call(
        kernel,
        out_shape=jax.ShapeDtypeStruct((B, S), out_dtype),
        grid=(n_b, n_s),
        in_specs=specs,
        out_specs=o_spec,
        scratch_shapes=[pltpu.VMEM((TB, S), jnp.float32)],
        compiler_params=pltpu.CompilerParams(
            dimension_semantics=("parallel", "arbitrary"),
            vmem_limit_bytes=vmem_limit,
        ),
    )(*ins)
    return out[:, None, :]                                # (B, 1, S)


# ---------------------------------------------------------------------------
# Pure-JAX reference (mirrors the PyTorch forward exactly, bias included)
# ---------------------------------------------------------------------------
def attn_reference(method, hidden, encoder_outputs, params):
    if method == "dot":
        energies = jnp.sum(hidden * encoder_outputs, axis=2)           # (S,B)
    elif method == "general":
        energy = encoder_outputs @ params["w"].T + params["b"]         # (S,B,H)
        energies = jnp.sum(hidden * energy, axis=2)                    # (S,B)
    elif method == "concat":
        S = encoder_outputs.shape[0]
        h_exp = jnp.broadcast_to(hidden, (S,) + hidden.shape[1:])
        cat = jnp.concatenate((h_exp, encoder_outputs), axis=2)        # (S,B,2H)
        energy = jnp.tanh(cat @ params["w"].T + params["b"])           # (S,B,H)
        energies = jnp.sum(params["v"] * energy, axis=2)               # (S,B)
    energies = energies.T                                              # (B,S)
    return jax.nn.softmax(energies, axis=1)[:, None, :]                # (B,1,S)


# ---------------------------------------------------------------------------
# Main
# ---------------------------------------------------------------------------
if __name__ == "__main__":
    B, S, H = 2, 8, 32
    key = jax.random.PRNGKey(0)
    k_h, k_e, k_wg, k_bg, k_wc, k_bc, k_v = jax.random.split(key, 7)

    hidden = jax.random.normal(k_h, (1, B, H), dtype=jnp.float32)
    encoder_outputs = jax.random.normal(k_e, (S, B, H), dtype=jnp.float32)

    # Deterministic synthetic parameters (shapes from the module's __init__).
    params = {
        "general": {
            "w": jax.random.normal(k_wg, (H, H), dtype=jnp.float32) * 0.1,
            "b": jax.random.normal(k_bg, (H,), dtype=jnp.float32) * 0.1,
        },
        "concat": {
            "w": jax.random.normal(k_wc, (H, 2 * H), dtype=jnp.float32) * 0.1,
            "b": jax.random.normal(k_bc, (H,), dtype=jnp.float32) * 0.1,
            "v": jax.random.normal(k_v, (H,), dtype=jnp.float32) * 0.1,
        },
        "dot": {},
    }

    for method in ("dot", "general", "concat"):
        out = attn_forward(method, hidden, encoder_outputs, params[method])
        out = jax.block_until_ready(out)
        ref = attn_reference(method, hidden, encoder_outputs, params[method])
        assert out.shape == (B, 1, S), (method, out.shape)
        assert jnp.allclose(out, ref, atol=1e-5, rtol=1e-5), method

    print("KERNEL_OK")
</pallas_src>

<mosaic_0001>
module attributes {stable_mosaic.version = 11 : i64} {
  func.func @_dot_kernel(%arg0: i32, %arg1: i32, %arg2: memref<1x2x32xf32, #tpu.memory_space<vmem>>, %arg3: memref<8x2x32xf32, #tpu.memory_space<vmem>>, %arg4: memref<2x8xf32, #tpu.memory_space<vmem>>, %arg5: memref<2x8xf32, #tpu.memory_space<vmem>>) attributes {dimension_semantics = [#tpu.dimension_semantics<parallel>, #tpu.dimension_semantics<arbitrary>], iteration_bounds = array<i64: 1, 1>, scalar_prefetch = 0 : i64, scratch_operands = 1 : i64, tpu.core_type = #tpu.core_type<tc>, window_params = [{transform_indices = @transform_0, window_bounds = array<i64: 1, 2, 32>}, {transform_indices = @transform_1, window_bounds = array<i64: 8, 2, 32>}, {transform_indices = @transform_2, window_bounds = array<i64: 2, 8>}]} {
    %c0 = arith.constant 0 : index
    %c0_0 = arith.constant 0 : index
    %c0_1 = arith.constant 0 : index
    %0 = vector.load %arg2[%c0, %c0_0, %c0_1] : memref<1x2x32xf32, #tpu.memory_space<vmem>>, vector<1x2x32xf32>
    %1 = vector.shape_cast %0 : vector<1x2x32xf32> to vector<2x32xf32>
    %c0_2 = arith.constant 0 : index
    %c0_3 = arith.constant 0 : index
    %c0_4 = arith.constant 0 : index
    %2 = vector.load %arg3[%c0_2, %c0_3, %c0_4] : memref<8x2x32xf32, #tpu.memory_space<vmem>>, vector<8x2x32xf32>
    %3 = vector.shape_cast %1 : vector<2x32xf32> to vector<1x2x32xf32>
    %4 = vector.broadcast %3 : vector<1x2x32xf32> to vector<8x2x32xf32>
    %5 = arith.mulf %2, %4 : vector<8x2x32xf32>
    %cst = arith.constant dense<0.000000e+00> : vector<8x2xf32>
    %6 = vector.multi_reduction <add>, %5, %cst [2] : vector<8x2x32xf32> to vector<8x2xf32>
    %7 = tpu.transpose %6, [1, 0] : vector<8x2xf32> -> vector<2x8xf32>
    %c0_5 = arith.constant 0 : index
    %c0_6 = arith.constant 0 : index
    %8 = vector.load %arg5[%c0_5, %c0_6] : memref<2x8xf32, #tpu.memory_space<vmem>>, vector<2x8xf32>
    tpu.vector_store %arg5[%c0_5, %c0_6], %7 {strides = array<i32>} : memref<2x8xf32, #tpu.memory_space<vmem>>, vector<2x8xf32>,
    %c0_i32 = arith.constant 0 : i32
    %9 = arith.cmpi eq, %arg1, %c0_i32 : i32
    %10 = arith.extui %9 : i1 to i32
    %c0_i32_7 = arith.constant 0 : i32
    %11 = arith.cmpi ne, %10, %c0_i32_7 : i32
    scf.if %11 {
      %c0_8 = arith.constant 0 : index
      %c0_9 = arith.constant 0 : index
      %12 = vector.load %arg5[%c0_8, %c0_9] : memref<2x8xf32, #tpu.memory_space<vmem>>, vector<2x8xf32>
      %cst_10 = arith.constant dense<0xFF800000> : vector<2xf32>
      %13 = vector.multi_reduction <maximumf>, %12, %cst_10 [1] : vector<2x8xf32> to vector<2xf32>
      %14 = vector.shape_cast %13 : vector<2xf32> to vector<2x1xf32>
      %15 = vector.broadcast %14 : vector<2x1xf32> to vector<2x8xf32>
      %16 = arith.subf %12, %15 : vector<2x8xf32>
      %17 = math.exp %16 : vector<2x8xf32>
      %cst_11 = arith.constant dense<0.000000e+00> : vector<2xf32>
      %18 = vector.multi_reduction <add>, %17, %cst_11 [1] : vector<2x8xf32> to vector<2xf32>
      %19 = vector.shape_cast %18 : vector<2xf32> to vector<2x1xf32>
      %20 = tpu.reciprocal %19 : vector<2x1xf32> -> vector<2x1xf32>
      %21 = vector.broadcast %20 : vector<2x1xf32> to vector<2x8xf32>
      %22 = arith.mulf %17, %21 : vector<2x8xf32>
      %c0_12 = arith.constant 0 : index
      %c0_13 = arith.constant 0 : index
      %23 = vector.load %arg4[%c0_12, %c0_13] : memref<2x8xf32, #tpu.memory_space<vmem>>, vector<2x8xf32>
      tpu.vector_store %arg4[%c0_12, %c0_13], %22 {strides = array<i32>} : memref<2x8xf32, #tpu.memory_space<vmem>>, vector<2x8xf32>,
    } else {
    }
    return
  }
  func.func @transform_0(%arg0: i32, %arg1: i32) -> (i32, i32, i32) {
    %c0_i32 = arith.constant 0 : i32
    %c0_i32_0 = arith.constant 0 : i32
    %c0_i32_1 = arith.constant 0 : i32
    return %c0_i32, %arg0, %c0_i32_0 : i32, i32, i32
  }
  func.func @transform_1(%arg0: i32, %arg1: i32) -> (i32, i32, i32) {
    %c0_i32 = arith.constant 0 : i32
    %c0_i32_0 = arith.constant 0 : i32
    return %arg1, %arg0, %c0_i32 : i32, i32, i32
  }
  func.func @transform_2(%arg0: i32, %arg1: i32) -> (i32, i32) {
    %c0_i32 = arith.constant 0 : i32
    %c0_i32_0 = arith.constant 0 : i32
    return %arg0, %c0_i32 : i32, i32
  }
}

</mosaic_0001>

<bundles_post_ra>
// kernel: attn_forward.1
= control target key start
LH: loop header
LB: loop body
LE: loop exit
PB: predicated region body
PF: predicated region fallthrough
CT: control target
= control target key end

     0   :  { %7 = vsyncpa [#allocation4], 0  ;;  %s361_s0 = inlined_call_operand.hbm [shape: f32[1,2,32], index: 0, kind: input, shape index: {}]   ;;  %s362_s1 = inlined_call_operand.hbm [shape: f32[8,2,32], index: 1, kind: input, shape index: {}]   ;;  %s363_s2 = inlined_call_operand.hbm [shape: f32[2,8], index: 2, kind: output, shape index: {}]  }
   0x1   :  { %8 = vsyncpa [#allocation7], 0 }
   0x2   :  { %9 = vsyncpa [#allocation5], 0  ;;  %s286_s9 = smov [#allocation3]   ;;  %s287_s11 = smov [#allocation6]  }
   0x3   :  { %s16_s10 = sshll.u32 %s286_s9, 4  ;;  %s25_s12 = sshll.u32 %s287_s11, 4  ;;  %s17_s10 = int_to_ptr.vmem [resolvable:$true] %s16_s10  ;;  %s306_s12 = int_to_ptr.vmem [resolvable:$true] %s25_s12 }
   0x4   :  { %s214_s15 = scalar_lea.hbm %s361_s0, 32 }
   0x5   :  { %p215_p0 = scmp.ne.s32.totalorder %s361_s0, %s214_s15  ;;  %p218_p1 = scmp.lt.u32.totalorder %s214_s15, %s361_s0 }
   0x7   :  { %p220_p2 = pnand %p218_p1, %p215_p0 }
   0x9   :  { %223 = shalt.err (!%p220_p2)
}
   0xa   :  { %s224_s20 = scalar_lea.vmem %s17_s10, 32  ;;  %p229_p4 = scmp.lt.s32.totalorder %s17_s10, %s17_s10 }
   0xb   :  { %p225_p3 = scmp.ne.s32.totalorder %s17_s10, %s224_s20  ;;  %p230_p5 = scmp.lt.s32.totalorder %s224_s20, %s224_s20 }
   0xd   :  { %p231_p6 = por %p230_p5, %p229_p4 }
   0xf   :  { %p232_p7 = pnand %p231_p6, %p225_p3 }
  0x11   :  { %235 = shalt.err (!%p232_p7)
}
  0x12   :  { %19 = dma.hbm_to_vmem [thread:$0]  %s361_s0, 32, %s17_s10, [#allocation4]  }
  0x13   :  { %s236_s25 = scalar_lea.hbm %s362_s1, 256 }
  0x14   :  { %p237_p8 = scmp.ne.s32.totalorder %s362_s1, %s236_s25  ;;  %p240_p9 = scmp.lt.u32.totalorder %s236_s25, %s362_s1 }
  0x16   :  { %p242_p10 = pnand %p240_p9, %p237_p8 }
  0x18   :  { %245 = shalt.err (!%p242_p10)
}
  0x19   :  { %s246_s30 = scalar_lea.vmem %s306_s12, 256  ;;  %p251_p12 = scmp.lt.s32.totalorder %s306_s12, %s306_s12 }
  0x1a   :  { %p247_p11 = scmp.ne.s32.totalorder %s306_s12, %s246_s30  ;;  %p252_p13 = scmp.lt.s32.totalorder %s246_s30, %s246_s30 }
  0x1c   :  { %p253_p0 = por %p252_p13, %p251_p12 }
  0x1e   :  { %p254_p1 = pnand %p253_p0, %p247_p11 }
  0x20   :  { %257 = shalt.err (!%p254_p1)
}
  0x21   :  { %s288_s0 = smov 32   ;;  %s289_s3 = smov 2  }
  0x22   :  { %31 = dma.hbm_to_vmem [thread:$0]  %s362_s1, 256, %s306_s12, [#allocation7], %s288_s0, %s288_s0, %s289_s3  }
  0x23   :  { %280 = dma.done.wait [#allocation4], 32  }
  0x24   :  { %281 = vsyncadd [#allocation4], 4294967264 }
  0x25   :  { %282 = dma.done.wait [#allocation7], 256  }
  0x26   :  { %283 = vsyncadd [#allocation7], 4294967040  ;;  %vm55_vm0 = vcmask 254976   ;;  %v38_v0 = vld [vmem:[#allocation3] sm:$0x3]  ;;  %v88_v25 = vlaneseq  ;;  %vm122_vm1 = vcmask 1041409  }
  0x27   :  { %v39_v1 = vld [vmem:[#allocation6] sm:$0x3]  ;;  %v41_v2 = vld [vmem:[#allocation6 + $0x4] sm:$0x3]  ;;  %v40_v5 = vld [vmem:[#allocation6 + $0x2] sm:$0x3] }
  0x28   :  { %v47_v3 = vmul.f32 %v39_v1, %v38_v0  ;;  %v49_v4 = vmul.f32 %v41_v2, %v38_v0  ;;  %v42_v6 = vld [vmem:[#allocation6 + $0x6] sm:$0x3]  ;;  %v48_v7 = vmul.f32 %v40_v5, %v38_v0  ;;  %v43_v9 = vld [vmem:[#allocation6 + $0x8] sm:$0x3]  ;;  %v44_v10 = vld [vmem:[#allocation6 + $0xa] sm:$0x3] }
  0x29   :  { %v50_v8 = vmul.f32 %v42_v6, %v38_v0  ;;  %v51_v15 = vmul.f32 %v43_v9, %v38_v0  ;;  %v52_v16 = vmul.f32 %v44_v10, %v38_v0  ;;  %v45_v17 = vld [vmem:[#allocation6 + $0xc] sm:$0x3]  ;;  %v46_v18 = vld [vmem:[#allocation6 + $0xe] sm:$0x3]  ;;  %v89_v26 = vand.u32 127, %v88_v25  ;;  %s290_s1 = smov [#allocation8]  }
  0x2a   :  { %v56_v11 = vsel %vm55_vm0, %v47_v3, 0.0  ;;  %v62_v12 = vsel %vm55_vm0, %v49_v4, 0.0  ;;  %v59_v13 = vsel %vm55_vm0, %v48_v7, 0.0  ;;  %v53_v21 = vmul.f32 %v45_v17, %v38_v0  ;;  %s194_s6 = sshll.u32 %s290_s1, 4  ;;  %s195_s6 = int_to_ptr.vmem [resolvable:$true] %s194_s6 }
  0x2b   :  { %57 = vadd.xlane.f32.xlu0 %v56_v11  ;;  %63 = vadd.xlane.f32.xlu1 %v62_v12  ;;  %v65_v14 = vsel %vm55_vm0, %v50_v8, 0.0  ;;  %v68_v19 = vsel %vm55_vm0, %v51_v15, 0.0  ;;  %v71_v20 = vsel %vm55_vm0, %v52_v16, 0.0  ;;  %v54_v22 = vmul.f32 %v46_v18, %v38_v0  ;;  %s258_s7 = scalar_lea.vmem %s195_s6, 32  ;;  %p263_p3 = scmp.lt.s32.totalorder %s195_s6, %s195_s6 }
  0x2c   :  { %v74_v23 = vsel %vm55_vm0, %v53_v21, 0.0  ;;  %v91_v27 = vshrl.u32 %v88_v25, 7  ;;  %vm124_vm2 = vcmask 1042434   ;;  %vm126_vm3 = vcmask 1043459   ;;  %p259_p2 = scmp.ne.s32.totalorder %s195_s6, %s258_s7  ;;  %p264_p4 = scmp.lt.s32.totalorder %s258_s7, %s258_s7 }
  0x2d   :  { %v77_v24 = vsel %vm55_vm0, %v54_v22, 0.0  ;;  %vm128_vm4 = vcmask 1044484   ;;  %vm130_vm5 = vcmask 1045509   ;;  %vm132_vm6 = vcmask 1046534  }
  0x2e   :  { %v92_v30 = vsub.s32 %v89_v26, %v91_v27  ;;  %vm134_vm7 = vcmask 1047559   ;;  %vm169_vm8 = vcmask 58368   ;;  %p265_p5 = por %p264_p4, %p263_p3 }
  0x2f   :  { %60 = vadd.xlane.f32.xlu0 %v59_v13  ;;  %66 = vadd.xlane.f32.xlu1 %v65_v14 }
  0x30   :  { %p266_p6 = pnand %p265_p5, %p259_p2 }
  0x33   :  { %69 = vadd.xlane.f32.xlu0 %v68_v19  ;;  %72 = vadd.xlane.f32.xlu1 %v71_v20 }
  0x37   :  { %75 = vadd.xlane.f32.xlu0 %v74_v23  ;;  %78 = vadd.xlane.f32.xlu1 %v77_v24 }
  0xb8   :  { %v58_v28 = vpop.xlane.xlu0 %57  ;;  %v64_v29 = vpop.xlane.xlu1 %63 }
  0xb9   :  { %v93_v33 = vrot.slane %v58_v28, %v92_v30  ;;  %v101_v36 = vrot.slane %v64_v29, %v92_v30 }
  0xbc   :  { %v61_v31 = vpop.xlane.xlu0 %60  ;;  %v67_v32 = vpop.xlane.xlu1 %66 }
  0xbd   :  { %v97_v34 = vrot.slane %v61_v31, %v92_v30  ;;  %v105_v35 = vrot.slane %v67_v32, %v92_v30 }
  0xbf   :  { %v123_v37 = vsel %vm122_vm1, %v97_v34, %v93_v33 }
  0xc0   :  { %v125_v38 = vsel %vm124_vm2, %v101_v36, %v123_v37  ;;  %v70_v39 = vpop.xlane.xlu0 %69  ;;  %v73_v40 = vpop.xlane.xlu1 %72 }
  0xc1   :  { %v127_v41 = vsel %vm126_vm3, %v105_v35, %v125_v38  ;;  %v109_v42 = vrot.slane %v70_v39, %v92_v30  ;;  %v113_v43 = vrot.slane %v73_v40, %v92_v30 }
  0xc3   :  { %v129_v44 = vsel %vm128_vm4, %v109_v42, %v127_v41 }
  0xc4   :  { %v76_v45 = vpop.xlane.xlu0 %75  ;;  %v79_v46 = vpop.xlane.xlu1 %78  ;;  %v131_v49 = vsel %vm130_vm5, %v113_v43, %v129_v44 }
  0xc5   :  { %v117_v47 = vrot.slane %v76_v45, %v92_v30  ;;  %v121_v48 = vrot.slane %v79_v46, %v92_v30 }
  0xc7   :  { %v133_v50 = vsel %vm132_vm6, %v117_v47, %v131_v49 }
  0xc8   :  { %v135_v51 = vsel %vm134_vm7, %v121_v48, %v133_v50 }
  0xc9   :  { %137 = vxpose.xlu0.b32.start.end [1/1] (short) (narrow) %v135_v51, 8 }
 0x149   :  { %v153_v52 = vpop.trf.xlu0 }
 0x14a   :  { %170 = vst.msk [vmem:[#allocation2] sm:$0x3] %vm169_vm8, %v153_v52 }
 0x151   :  { %v175_v53 = vld [vmem:[#allocation2] sm:$0x3] }
 0x152   :  { %v176_v54 = vsel %vm169_vm8, %v175_v53, -inf }
 0x153   :  { %177 = vmax.xlane.f32.xlu1 %v176_v54 }
 0x1e0   :  { %v178_v55 = vpop.xlane.xlu1 %177 }
 0x1e1   :  { %v179_v56 = vsub.f32 %v175_v53, %v178_v55 }
 0x1e3   :  { %v180_v57 = vmul.f32 1.442695, %v179_v56 }
 0x1e5   :  { %210 = vpow2.f32 %v180_v57 }
 0x1ef   :  { %v211_v58 = vpop.eup %210 }
 0x1f0   :  { %v182_v59 = vsel %vm169_vm8, %v211_v58, 0.0 }
 0x1f1   :  { %183 = vadd.xlane.f32.xlu1 %v182_v59 }
 0x27e   :  { %v184_v60 = vpop.xlane.xlu1 %183 }
 0x27f   :  { %212 = vrcp.f32 %v184_v60 }
 0x289   :  { %v213_v61 = vpop.eup %212 }
 0x28a   :  { %v186_v62 = vmul.f32 %v213_v61, %v211_v58 }
 0x28c   :  { %187 = vst.msk [vmem:[#allocation8] sm:$0x3] %vm169_vm8, %v186_v62 }
 0x28d   :  { %269 = shalt.err (!%p266_p6)
}
 0x28e   :  { %s270_s10 = scalar_lea.hbm %s363_s2, 32 }
 0x28f   :  { %p271_p7 = scmp.ne.s32.totalorder %s363_s2, %s270_s10  ;;  %p274_p8 = scmp.lt.u32.totalorder %s270_s10, %s363_s2 }
 0x291   :  { %p276_p9 = pnand %p274_p8, %p271_p7 }
 0x293   :  { %279 = shalt.err (!%p276_p9)
}
 0x294   :  { %197 = dma.vmem_to_hbm [thread:$0]  %s195_s6, 32, %s363_s2, [#allocation5]  }
 0x295   :  { %284 = dma.done.wait [#allocation5], 32  }
 0x296   :  { %285 = vsyncadd [#allocation5], 4294967264 }
 0x297   :  { %201 = vsyncpa [#allocation4], 1 }
 0x298   :  { %202 = vsyncpa [#allocation7], 1 }
 0x299   :  { %203 = vsyncpa [#allocation5], 1 }

</bundles_post_ra>
